<compile_context>
chip_gen: v7x
topology: tpu7x:2x2x1
jax: 0.10.0
libtpu: 0.0.40
codegen_flags: <defaults>
</compile_context>

<pallas_src>
import jax
import jax.numpy as jnp
from jax import lax
from jax.experimental import pallas as pl
from jax.experimental.pallas import tpu as pltpu


# ------------------------------ configuration -------------------------------

PATCH = 4        # stand-in backbone patch size
C_IN = 32        # backbone.in_features  (ViT width stand-in)
D_EMB = 16       # backbone.out_features (CLIP text-embedding dim stand-in), multiple of 8
# bins: [(0,0),(1,1),(2,2),(3,3),(4,inf)]  -> bin_centers [0,1,2,3,5]
BIN_CENTERS = jnp.array([0.0, 1.0, 2.0, 3.0, 5.0], dtype=jnp.float32)
N_PI = 2
N_LAM = BIN_CENTERS.shape[0] - 1

PI_PAD = 8       # pi logit row padded to one full sublane tile (keeps slices 8-aligned)
LAM_PAD = 8      # lambda bins padded to one full sublane tile (masked in-kernel)
NEG_BIG = -1e30  # softmax mask value for padded bins


# ----------------------------- Pallas kernel --------------------------------

def clip_ebc_head_kernel(xT_ref,    # VMEM (C_IN, TP)     bf16  features, pixels on lanes
                         wf_ref,    # VMEM (2D+16, C_IN)  bf16  fused [w_pi.T ; w_lam.T ; t_fused @ w_T]
                         cen_ref,   # VMEM (8, 1)         f32   bin_centers[1:], zero padded
                         msk_ref,   # VMEM (8, 1)         f32   0 for real bins, -1e30 for padding
                         out_ref):  # VMEM (1, TP)        f32   density per pixel (lane-dense)
    d = (wf_ref.shape[0] - (PI_PAD + LAM_PAD)) // 2

    # Single fused bf16 MXU matmul, f32 accumulation:
    #   rows [0, d)      : pi-head features      (used only for their L2 norm)
    #   rows [d, 2d)     : lambda-head features  (used only for their L2 norm)
    #   rows [2d, 2d+16) : scale-folded, un-normalized cosine logits (block-diag text matrix)
    y = jnp.dot(wf_ref[...], xT_ref[...], preferred_element_type=jnp.float32)   # (2d+16, TP)

    y_pi = y[:d, :]
    y_lam = y[d:2 * d, :]

    # F.normalize(p=2, eps=1e-12) folded into per-pixel rsqrt scales (EUP slot),
    # applied to the few logit rows instead of the (d, TP) feature rows:
    #   x / max(||x||, eps) == x * rsqrt(max(||x||^2, eps^2)).
    inv_pi = lax.rsqrt(jnp.maximum(jnp.sum(y_pi * y_pi, axis=0, keepdims=True), 1e-24))
    inv_lam = lax.rsqrt(jnp.maximum(jnp.sum(y_lam * y_lam, axis=0, keepdims=True), 1e-24))

    pi_logit = y[2 * d:2 * d + 1, :] * inv_pi                                    # (1, TP)
    lam_logits = (y[2 * d + PI_PAD:2 * d + PI_PAD + LAM_PAD, :] * inv_lam
                  + msk_ref[...])                                                # (8, TP)

    # Softmax over bins + expectation with bin_centers[1:]; single EUP reciprocal.
    m = jnp.max(lam_logits, axis=0, keepdims=True)
    e = jnp.exp(lam_logits - m)
    denom = jnp.sum(e, axis=0, keepdims=True)
    num = jnp.sum(e * cen_ref[...], axis=0, keepdims=True)
    lam_map = num * pl.reciprocal(denom, approx=True)                            # (1, TP)

    # pi softmax over 2 classes, class 1  ==  sigmoid(logit_1 - logit_0)
    #                                      ==  0.5 * (1 + tanh(x / 2))   (EUP tanh).
    gate = 0.5 * (1.0 + jnp.tanh(0.5 * pi_logit))                                # (1, TP)

    out_ref[...] = gate * lam_map                                                # lane-dense store


def clip_ebc_head(x_t, w_fused, cen_col, msk_col, *, tile_p_max=32768):
    """x_t: (C_IN, P) bf16 backbone features (pixels on lanes). Returns (P,) f32 density."""
    c_in, P = x_t.shape
    rows = w_fused.shape[0]

    # Large lane-dense tiles (multiple of 128), capped at tile_p_max.  Keep >= 2 tiles
    # whenever P > 128 so the 'parallel' grid axis can span both TensorCores on v7x.
    tile_p = max(128, min(tile_p_max, pl.cdiv(P, 2 * 128) * 128))
    num_tiles = pl.cdiv(P, tile_p)
    p_pad = num_tiles * tile_p
    # No host-side padding of x: a partial last block is handled by Pallas; any garbage
    # lanes only affect lane-local math and the corresponding outputs are sliced off.

    out = pl.pallas_call(
        clip_ebc_head_kernel,
        out_shape=jax.ShapeDtypeStruct((1, p_pad), jnp.float32),
        grid=(num_tiles,),
        in_specs=[
            pl.BlockSpec((c_in, tile_p), lambda i: (0, i)),       # x: only per-step DMA
            pl.BlockSpec((rows, c_in), lambda i: (0, 0)),         # fused weights (resident)
            pl.BlockSpec(cen_col.shape, lambda i: (0, 0)),        # bin centers (resident)
            pl.BlockSpec(msk_col.shape, lambda i: (0, 0)),        # bin mask (resident)
        ],
        out_specs=pl.BlockSpec((1, tile_p), lambda i: (0, i)),
        compiler_params=pltpu.CompilerParams(
            dimension_semantics=("parallel",),
            vmem_limit_bytes=48 * 1024 * 1024,                    # < 64 MiB physical on v7x
        ),
    )(x_t, w_fused, cen_col, msk_col)

    return out.reshape(p_pad)[:P]


# ------------------------------ model wrapper --------------------------------

def init_params(key):
    ks = jax.random.split(key, 5)
    w_patch = jax.random.normal(ks[0], (3 * PATCH * PATCH, C_IN), jnp.float32) * 0.05
    w_pi = jax.random.normal(ks[1], (C_IN, D_EMB), jnp.float32) * 0.1
    w_lam = jax.random.normal(ks[2], (C_IN, D_EMB), jnp.float32) * 0.1
    t_pi = jax.random.normal(ks[3], (N_PI, D_EMB), jnp.float32)
    t_lam = jax.random.normal(ks[4], (N_LAM, D_EMB), jnp.float32)
    # CLIP text features are L2-normalized
    t_pi = t_pi / jnp.linalg.norm(t_pi, axis=-1, keepdims=True)
    t_lam = t_lam / jnp.linalg.norm(t_lam, axis=-1, keepdims=True)
    log_scales = jnp.full((2,), jnp.log(1.0 / 0.07), dtype=jnp.float32)
    return dict(w_patch=w_patch, w_pi=w_pi, w_lam=w_lam,
                t_pi=t_pi, t_lam=t_lam, log_scales=log_scales)


def _backbone_stand_in_T(image, params):
    """Deterministic patch-embed stand-in for the CLIP ViT backbone (plain JAX glue).

    Emits features directly in the kernel's (C_IN, P) bf16 layout so no extra
    transpose / pad / cast passes over the feature map are needed.
    """
    # TODO(synk): replace with real CLIP ViT backbone (transformer blocks, VPT).
    B, C, H, W = image.shape
    hp, wp = H // PATCH, W // PATCH
    patches = image.reshape(B, C, hp, PATCH, wp, PATCH)
    patches = jnp.transpose(patches, (0, 2, 4, 1, 3, 5)).reshape(B * hp * wp, C * PATCH * PATCH)
    # (C_IN, P) bf16 directly: contract K of w_patch with K of patches (no materialized transpose).
    x_t = lax.dot_general(
        params["w_patch"].astype(jnp.bfloat16), patches.astype(jnp.bfloat16),
        dimension_numbers=(((0,), (1,)), ((), ())),
        preferred_element_type=jnp.bfloat16)                      # (C_IN, B*hp*wp)
    return x_t, B, hp, wp


def _build_head_constants(params):
    """Per-forward prep: fuse conv1x1 heads + scale-folded text matrix into ONE bf16 weight."""
    d = D_EMB
    pi_scale = jnp.exp(params["log_scales"][0])
    lam_scale = jnp.exp(params["log_scales"][1])
    # Fused 1x1-conv heads: (2D, C_IN).
    w_T = jnp.concatenate([params["w_pi"], params["w_lam"]], axis=1).T
    # Block-diagonal, scale-folded text matrix (16, 2D):
    #   row 0          = exp(pi_logit_scale)  * (t_pi[1] - t_pi[0])  -> sigmoid gate
    #   rows 8..8+Nl-1 = exp(lam_logit_scale) * t_lambda
    t_fused = jnp.zeros((PI_PAD + LAM_PAD, 2 * d), jnp.float32)
    t_fused = t_fused.at[0, :d].set(pi_scale * (params["t_pi"][1] - params["t_pi"][0]))
    t_fused = t_fused.at[PI_PAD:PI_PAD + N_LAM, d:].set(lam_scale * params["t_lam"])
    # Fold the logit matmul into the conv matmul: z = (t_fused @ w_T) @ x  -> one MXU call.
    tw = t_fused @ w_T                                            # (16, C_IN)
    w_fused = jnp.concatenate([w_T, tw], axis=0).astype(jnp.bfloat16)   # (2D+16, C_IN)
    cen_col = jnp.zeros((LAM_PAD, 1), jnp.float32).at[:N_LAM, 0].set(BIN_CENTERS[1:])
    msk_col = jnp.full((LAM_PAD, 1), NEG_BIG, jnp.float32).at[:N_LAM, 0].set(0.0)
    return w_fused, cen_col, msk_col


def clip_ebc_forward(image, params, *, tile_p_max=32768):
    """image: (B, 3, H, W) NCHW float32. Returns den_map (B, 1, H/PATCH, W/PATCH)."""
    x_t, B, hp, wp = _backbone_stand_in_T(image, params)          # (C_IN, P) bf16
    w_fused, cen_col, msk_col = _build_head_constants(params)
    den_flat = clip_ebc_head(x_t, w_fused, cen_col, msk_col, tile_p_max=tile_p_max)  # (P,)
    return den_flat.reshape(B, hp, wp)[:, None, :, :]             # (B, 1, hp, wp)


# ----------------------- pure-JAX reference (for checks) ---------------------

def _reference_forward(image, params):
    """Mirrors the torch eval forward in plain JAX (same backbone features / bf16 conv heads)."""
    x_t, B, hp, wp = _backbone_stand_in_T(image, params)
    x = x_t.T                                                     # (P, C_IN) bf16

    pi_scale = jnp.exp(params["log_scales"][0])
    lam_scale = jnp.exp(params["log_scales"][1])
    pf = jnp.dot(x, params["w_pi"].astype(jnp.bfloat16), preferred_element_type=jnp.float32)
    lf = jnp.dot(x, params["w_lam"].astype(jnp.bfloat16), preferred_element_type=jnp.float32)
    pf = pf / jnp.maximum(jnp.linalg.norm(pf, axis=-1, keepdims=True), 1e-12)
    lf = lf / jnp.maximum(jnp.linalg.norm(lf, axis=-1, keepdims=True), 1e-12)
    pi_logits = pi_scale * (pf @ params["t_pi"].T)                # (P, 2)
    lam_logits = lam_scale * (lf @ params["t_lam"].T)             # (P, N_LAM)
    pi_p = jax.nn.softmax(pi_logits, axis=-1)
    lam_p = jax.nn.softmax(lam_logits, axis=-1)
    lam_map = jnp.sum(lam_p * BIN_CENTERS[1:][None, :], axis=-1)
    den = pi_p[:, 1] * lam_map
    return den.reshape(B, hp, wp)[:, None, :, :]


# ---------------------------------- main -------------------------------------

if __name__ == "__main__":
    key = jax.random.PRNGKey(0)
    pkey, xkey = jax.random.split(key)
    params = init_params(pkey)

    # (B=2, C=3, H=W=32) -> 8x8 density map per image, P = 128 feature pixels total.
    image = jax.random.normal(xkey, (2, 3, 32, 32), jnp.float32)

    fwd = jax.jit(clip_ebc_forward)
    den_map = jax.block_until_ready(fwd(image, params))

    assert den_map.shape == (2, 1, 8, 8), den_map.shape
    assert bool(jnp.all(jnp.isfinite(den_map)))
    assert bool(jnp.all(den_map >= 0.0))  # softmax-weighted nonneg bin centers

    ref_map = jax.block_until_ready(jax.jit(_reference_forward)(image, params))
    # bf16 fused weights + approx reciprocal => allow bf16-level tolerance.
    assert bool(jnp.allclose(den_map, ref_map, rtol=5e-2, atol=1e-3)), \
        float(jnp.max(jnp.abs(den_map - ref_map)))

    print("KERNEL_OK")
</pallas_src>

<mosaic_0001>
module attributes {stable_mosaic.version = 11 : i64} {
  func.func @clip_ebc_head_kernel(%arg0: i32, %arg1: memref<32x128xbf16, #tpu.memory_space<vmem>>, %arg2: memref<48x32xbf16, #tpu.memory_space<vmem>>, %arg3: memref<8x1xf32, #tpu.memory_space<vmem>>, %arg4: memref<8x1xf32, #tpu.memory_space<vmem>>, %arg5: memref<1x128xf32, #tpu.memory_space<vmem>>) attributes {dimension_semantics = [#tpu.dimension_semantics<parallel>], iteration_bounds = array<i64: 1>, scalar_prefetch = 0 : i64, scratch_operands = 0 : i64, tpu.core_type = #tpu.core_type<tc>, window_params = [{transform_indices = @transform_0, window_bounds = array<i64: 32, 128>}, {pipeline_mode = #tpu.pipeline_mode<synchronous>, transform_indices = @transform_1, window_bounds = array<i64: 48, 32>}, {pipeline_mode = #tpu.pipeline_mode<synchronous>, transform_indices = @transform_2, window_bounds = array<i64: 8, 1>}, {pipeline_mode = #tpu.pipeline_mode<synchronous>, transform_indices = @transform_3, window_bounds = array<i64: 8, 1>}, {transform_indices = @transform_4, window_bounds = array<i64: 1, 128>}]} {
    %c0 = arith.constant 0 : index
    %c0_0 = arith.constant 0 : index
    %0 = vector.load %arg2[%c0, %c0_0] : memref<48x32xbf16, #tpu.memory_space<vmem>>, vector<48x32xbf16>
    %c0_1 = arith.constant 0 : index
    %c0_2 = arith.constant 0 : index
    %1 = vector.load %arg1[%c0_1, %c0_2] : memref<32x128xbf16, #tpu.memory_space<vmem>>, vector<32x128xbf16>
    %cst = arith.constant dense<0.000000e+00> : vector<48x128xf32>
    %2 = tpu.matmul %0, %1, %cst {dimension_numbers = #tpu.dot_dimension_numbers<[1], [0], [0], [1], [0, 0, 1, 1], [], []>} : vector<48x32xbf16>, vector<32x128xbf16>, vector<48x128xf32> -> vector<48x128xf32>
    %3 = vector.extract_strided_slice %2 {offsets = [0, 0], sizes = [16, 128], strides = [1, 1]} : vector<48x128xf32> to vector<16x128xf32>
    %4 = vector.extract_strided_slice %2 {offsets = [16, 0], sizes = [16, 128], strides = [1, 1]} : vector<48x128xf32> to vector<16x128xf32>
    %5 = arith.mulf %3, %3 : vector<16x128xf32>
    %cst_3 = arith.constant dense<0.000000e+00> : vector<128xf32>
    %6 = vector.multi_reduction <add>, %5, %cst_3 [0] : vector<16x128xf32> to vector<128xf32>
    %7 = vector.shape_cast %6 : vector<128xf32> to vector<1x128xf32>
    %cst_4 = arith.constant 1.000000e-24 : f32
    %8 = vector.broadcast %cst_4 : f32 to vector<1x128xf32>
    %9 = arith.maximumf %7, %8 : vector<1x128xf32>
    %10 = math.rsqrt %9 : vector<1x128xf32>
    %11 = arith.mulf %4, %4 : vector<16x128xf32>
    %cst_5 = arith.constant dense<0.000000e+00> : vector<128xf32>
    %12 = vector.multi_reduction <add>, %11, %cst_5 [0] : vector<16x128xf32> to vector<128xf32>
    %13 = vector.shape_cast %12 : vector<128xf32> to vector<1x128xf32>
    %cst_6 = arith.constant 1.000000e-24 : f32
    %14 = vector.broadcast %cst_6 : f32 to vector<1x128xf32>
    %15 = arith.maximumf %13, %14 : vector<1x128xf32>
    %16 = math.rsqrt %15 : vector<1x128xf32>
    %17 = vector.extract_strided_slice %2 {offsets = [32, 0], sizes = [1, 128], strides = [1, 1]} : vector<48x128xf32> to vector<1x128xf32>
    %18 = arith.mulf %17, %10 : vector<1x128xf32>
    %19 = vector.extract_strided_slice %2 {offsets = [40, 0], sizes = [8, 128], strides = [1, 1]} : vector<48x128xf32> to vector<8x128xf32>
    %20 = vector.broadcast %16 : vector<1x128xf32> to vector<8x128xf32>
    %21 = arith.mulf %19, %20 : vector<8x128xf32>
    %c0_7 = arith.constant 0 : index
    %c0_8 = arith.constant 0 : index
    %22 = vector.load %arg4[%c0_7, %c0_8] : memref<8x1xf32, #tpu.memory_space<vmem>>, vector<8x1xf32>
    %23 = vector.broadcast %22 : vector<8x1xf32> to vector<8x128xf32>
    %24 = arith.addf %21, %23 : vector<8x128xf32>
    %cst_9 = arith.constant dense<0xFF800000> : vector<128xf32>
    %25 = vector.multi_reduction <maximumf>, %24, %cst_9 [0] : vector<8x128xf32> to vector<128xf32>
    %26 = vector.shape_cast %25 : vector<128xf32> to vector<1x128xf32>
    %27 = vector.broadcast %26 : vector<1x128xf32> to vector<8x128xf32>
    %28 = arith.subf %24, %27 : vector<8x128xf32>
    %29 = math.exp %28 : vector<8x128xf32>
    %cst_10 = arith.constant dense<0.000000e+00> : vector<128xf32>
    %30 = vector.multi_reduction <add>, %29, %cst_10 [0] : vector<8x128xf32> to vector<128xf32>
    %31 = vector.shape_cast %30 : vector<128xf32> to vector<1x128xf32>
    %c0_11 = arith.constant 0 : index
    %c0_12 = arith.constant 0 : index
    %32 = vector.load %arg3[%c0_11, %c0_12] : memref<8x1xf32, #tpu.memory_space<vmem>>, vector<8x1xf32>
    %33 = vector.broadcast %32 : vector<8x1xf32> to vector<8x128xf32>
    %34 = arith.mulf %29, %33 : vector<8x128xf32>
    %cst_13 = arith.constant dense<0.000000e+00> : vector<128xf32>
    %35 = vector.multi_reduction <add>, %34, %cst_13 [0] : vector<8x128xf32> to vector<128xf32>
    %36 = vector.shape_cast %35 : vector<128xf32> to vector<1x128xf32>
    %37 = tpu.reciprocal %31 {approx = true} : vector<1x128xf32> -> vector<1x128xf32>
    %38 = arith.mulf %36, %37 : vector<1x128xf32>
    %cst_14 = arith.constant 5.000000e-01 : f32
    %39 = vector.broadcast %cst_14 : f32 to vector<1x128xf32>
    %40 = arith.mulf %39, %18 : vector<1x128xf32>
    %41 = math.tanh %40 : vector<1x128xf32>
    %cst_15 = arith.constant 1.000000e+00 : f32
    %42 = vector.broadcast %cst_15 : f32 to vector<1x128xf32>
    %43 = arith.addf %42, %41 : vector<1x128xf32>
    %cst_16 = arith.constant 5.000000e-01 : f32
    %44 = vector.broadcast %cst_16 : f32 to vector<1x128xf32>
    %45 = arith.mulf %44, %43 : vector<1x128xf32>
    %46 = arith.mulf %45, %38 : vector<1x128xf32>
    %c0_17 = arith.constant 0 : index
    %c0_18 = arith.constant 0 : index
    %47 = vector.load %arg5[%c0_17, %c0_18] : memref<1x128xf32, #tpu.memory_space<vmem>>, vector<1x128xf32>
    tpu.vector_store %arg5[%c0_17, %c0_18], %46 {strides = array<i32>} : memref<1x128xf32, #tpu.memory_space<vmem>>, vector<1x128xf32>,
    return
  }
  func.func @transform_0(%arg0: i32) -> (i32, i32) {
    %c0_i32 = arith.constant 0 : i32
    %c0_i32_0 = arith.constant 0 : i32
    return %c0_i32, %arg0 : i32, i32
  }
  func.func @transform_1(%arg0: i32) -> (i32, i32) {
    %c0_i32 = arith.constant 0 : i32
    %c0_i32_0 = arith.constant 0 : i32
    %c0_i32_1 = arith.constant 0 : i32
    return %c0_i32, %c0_i32_0 : i32, i32
  }
  func.func @transform_2(%arg0: i32) -> (i32, i32) {
    %c0_i32 = arith.constant 0 : i32
    %c0_i32_0 = arith.constant 0 : i32
    %c0_i32_1 = arith.constant 0 : i32
    return %c0_i32, %c0_i32_0 : i32, i32
  }
  func.func @transform_3(%arg0: i32) -> (i32, i32) {
    %c0_i32 = arith.constant 0 : i32
    %c0_i32_0 = arith.constant 0 : i32
    %c0_i32_1 = arith.constant 0 : i32
    return %c0_i32, %c0_i32_0 : i32, i32
  }
  func.func @transform_4(%arg0: i32) -> (i32, i32) {
    %c0_i32 = arith.constant 0 : i32
    %c0_i32_0 = arith.constant 0 : i32
    return %c0_i32, %arg0 : i32, i32
  }
}

</mosaic_0001>

<bundles_post_ra>
// kernel: clip_ebc_forward.1
= control target key start
LH: loop header
LB: loop body
LE: loop exit
PB: predicated region body
PF: predicated region fallthrough
CT: control target
= control target key end

     0   :  { %v245_v0 = vmov 0.0   ;;  %vm246_vm0 = vmmov 0   ;;  %v247_v3 = vmov 0   ;;  %vm55_vm1 = vcmask 261120   ;;  %s300_s0 = inlined_call_operand.vmem [shape: bf16[32,128], index: 0, kind: input, shape index: {}]   ;;  %s301_s1 = inlined_call_operand.vmem [shape: bf16[48,32], index: 1, kind: input, shape index: {}]   ;;  %s302_s3 = inlined_call_operand.vmem [shape: f32[8,1], index: 3, kind: input, shape index: {}]   ;;  %s303_s2 = inlined_call_operand.vmem [shape: f32[8,1], index: 2, kind: input, shape index: {}]   ;;  %s304_s4 = inlined_call_operand.vmem [shape: f32[1,128], index: 4, kind: output, shape index: {}]  }
   0x1   :  { %206 = vmatprep.subr.bf16.mxu0 %v245_v0  ;;  %222 = vmatprep.subr.bf16.mxu1 %v245_v0  ;;  %v230_v1 = vld [vmem:[%s300_s0] sm:$0xff]   ;;  %v231_v2 = vld [vmem:[%s300_s0 + $0x8] sm:$0xff]   ;;  %v234_v8 = vld [vmem:[%s301_s1 + $0x10] sm:$0xff]  }
   0x2   :  { %210 = vmatprep.mubr.msk.bf16.mxu0 %vm246_vm0, %v245_v0  ;;  %214 = vmatprep.mubr.msk.bf16.mxu1 %vm246_vm0, %v245_v0  ;;  %v232_v4 = vld [vmem:[%s301_s1] sm:$0xff]   ;;  %v233_v5 = vld [vmem:[%s301_s1 + $0x8] sm:$0xff]  }
   0x3   :  { %207 = vmatpush3.bf16.msra.mxu0 %v230_v1  ;;  %224 = vmatpush3.bf16.msra.mxu1 %v230_v1  ;;  %v146_v6 = vld [vmem:[%s302_s3] sm:$0xff] }
   0x4   :  { %208 = vmatprep.subr.bf16.mxu0 %v245_v0  ;;  %223 = vmatprep.subr.bf16.mxu1 %v245_v0  ;;  %v168_v7 = vld [vmem:[%s303_s2] sm:$0xff] }
   0x5   :  { %229 = vset.pattern.permute.xlu0 %v247_v3 }
   0x6   :  { %149 = vperm.xlu0 %229, %v146_v6  }
   0x7   :  { %209 = vmatpush3.bf16.msra.mxu0 %v231_v2  ;;  %225 = vmatpush3.bf16.msra.mxu1 %v231_v2 }
   0xa   :  { %211 = vmatmul.mubr.msk.bf16.vlgmr.msra.gmra.mrb[0].mxu0 %vm55_vm1, %v232_v4  ;;  %215 = vmatmul.mubr.msk.bf16.vlgmr.msra.gmra.mrb[0].mxu1 %vm55_vm1, %v233_v5 }
   0xb   :  { %218 = vmatprep.mubr.msk.bf16.mxu1 %vm246_vm0, %v245_v0  ;;  %171 = vperm.xlu0 %229, %v168_v7  }
  0x12   :  { %219 = vmatmul.mubr.msk.bf16.gmra.mrb[4].mxu1 %vm55_vm1, %v234_v8 }
  0x85   :  { %v150_v45 = vpop.permute.xlu0 %149 }
  0x8a   :  { %v172_v56 = vpop.permute.xlu0 %171 }
  0xdd   :  { %v99_v9 = vpop.f32.mrb[0].mxu0  ;;  %v107_v10 = vpop.f32.mrb[0].mxu1 }
  0xde   :  { %v122_v11 = vmul.f32 %v99_v9, %v99_v9  ;;  %v212_v12 = vpop.f32.mrb[1].mxu0  ;;  %v216_v13 = vpop.f32.mrb[1].mxu1  ;;  %v133_v16 = vmul.f32 %v107_v10, %v107_v10 }
  0xdf   :  { %v102_v14 = vpop.f32.mrb[2].mxu0  ;;  %v110_v15 = vpop.f32.mrb[2].mxu1 }
  0xe0   :  { %v123_v17 = vmul.f32 %v102_v14, %v102_v14  ;;  %v134_v18 = vmul.f32 %v110_v15, %v110_v15  ;;  %v217_v19 = vpop.f32.mrb[3].mxu1  ;;  %v213_v20 = vpop.f32.mrb[3].mxu0 }
  0xe2   :  { %v124_v21 = vadd.f32 %v123_v17, %v122_v11  ;;  %v135_v22 = vadd.f32 %v134_v18, %v133_v16 }
  0xe4   :  { %v125_v23 = vrot.slane %v124_v21, 4  ;;  %v136_v24 = vrot.slane %v135_v22, 4 }
  0xe5   :  { %v115_v25 = vpop.f32.mrb[4].mxu1 }
  0xe6   :  { %v126_v26 = vadd.f32 %v125_v23, %v124_v21  ;;  %v137_v27 = vadd.f32 %v136_v24, %v135_v22  ;;  %v220_v28 = vpop.f32.mrb[5].mxu1 }
  0xe7   :  { %v118_v29 = vpop.f32.mrb[6].mxu1 }
  0xe8   :  { %v127_v30 = vrot.slane %v126_v26, 2  ;;  %v138_v31 = vrot.slane %v137_v27, 2  ;;  %v221_v32 = vpop.f32.mrb[7].mxu1 }
  0xea   :  { %v128_v33 = vadd.f32 %v127_v30, %v126_v26  ;;  %v139_v34 = vadd.f32 %v138_v31, %v137_v27 }
  0xec   :  { %v129_v35 = vrot.slane %v128_v33, 1  ;;  %v140_v36 = vrot.slane %v139_v34, 1 }
  0xee   :  { %v130_v37 = vadd.f32 %v129_v35, %v128_v33  ;;  %v141_v38 = vadd.f32 %v140_v36, %v139_v34 }
  0xf0   :  { %v131_v39 = vmax.f32 %v130_v37, 1e-24  ;;  %v142_v40 = vmax.f32 %v141_v38, 1e-24 }
  0xf2   :  { %235 = vrsqrt.f32 %v131_v39 }
  0xf3   :  { %237 = vrsqrt.f32 %v142_v40 }
  0xfc   :  { %v236_v41 = vpop.eup %235 }
  0xfd   :  { %v238_v42 = vpop.eup %237  ;;  %v144_v43 = vmul.f32 %v236_v41, %v115_v25 }
  0xfe   :  { %v145_v44 = vmul.f32 %v238_v42, %v118_v29 }
  0xff   :  { %v183_v59 = vmul.f32 0.5, %v144_v43 }
 0x100   :  { %v152_v46 = vadd.f32 %v150_v45, %v145_v44 }
 0x102   :  { %v153_v47 = vrot.slane %v152_v46, 4 }
 0x104   :  { %v154_v48 = vmax.f32 %v152_v46, %v153_v47 }
 0x106   :  { %v155_v49 = vrot.slane %v154_v48, 2 }
 0x108   :  { %v156_v50 = vmax.f32 %v154_v48, %v155_v49 }
 0x10a   :  { %v157_v51 = vrot.slane %v156_v50, 1 }
 0x10c   :  { %v158_v52 = vmax.f32 %v156_v50, %v157_v51 }
 0x10e   :  { %v159_v53 = vsub.f32 %v152_v46, %v158_v52 }
 0x110   :  { %v160_v54 = vmul.f32 1.442695, %v159_v53 }
 0x112   :  { %239 = vpow2.f32 %v160_v54 }
 0x113   :  { %241 = vtanh.f32 %v183_v59 }
 0x11c   :  { %v240_v55 = vpop.eup %239 }
 0x11d   :  { %v162_v57 = vrot.slane %v240_v55, 4  ;;  %v174_v58 = vmul.f32 %v240_v55, %v172_v56  ;;  %v242_v5 = vpop.eup %241 }
 0x11e   :  { %v185_v7 = vadd.f32 1.0, %v242_v5 }
 0x11f   :  { %v163_v60 = vadd.f32 %v240_v55, %v162_v57  ;;  %v175_v61 = vrot.slane %v174_v58, 4 }
 0x120   :  { %v186_v10 = vmul.f32 0.5, %v185_v7 }
 0x121   :  { %v164_v62 = vrot.slane %v163_v60, 2  ;;  %v176_v63 = vadd.f32 %v175_v61, %v174_v58 }
 0x123   :  { %v165_v0 = vadd.f32 %v164_v62, %v163_v60  ;;  %v177_v2 = vrot.slane %v176_v63, 2 }
 0x125   :  { %v166_v1 = vrot.slane %v165_v0, 1  ;;  %v178_v4 = vadd.f32 %v177_v2, %v176_v63 }
 0x127   :  { %v167_v3 = vadd.f32 %v166_v1, %v165_v0  ;;  %v179_v6 = vrot.slane %v178_v4, 1 }
 0x129   :  { %243 = vrcp.f32 %v167_v3  ;;  %v180_v8 = vadd.f32 %v179_v6, %v178_v4 }
 0x133   :  { %v244_v9 = vpop.eup %243 }
 0x134   :  { %v182_v11 = vmul.f32 %v244_v9, %v180_v8 }
 0x136   :  { %v187_v12 = vmul.f32 %v186_v10, %v182_v11 }
 0x138   :  { %188 = vst [vmem:[%s304_s4] sm:$0x1] %v187_v12 }

</bundles_post_ra>
